<compile_context>
chip_gen: v6e
topology: v6e:2x2x1
jax: 0.10.0
libtpu: 0.0.40
codegen_flags: <defaults>
</compile_context>

<pallas_src>
import functools

import jax
import jax.numpy as jnp
from jax import lax
from jax.experimental import pallas as pl
from jax.experimental.pallas import tpu as pltpu


def _nll_seq_loss_kernel(w_ref, x_ref, tgt_ref, len_ref, out_ref, *,
                         seq_len, num_classes):
    """One batch tile.

    w_ref   : (1, C_pad)    f32 class weights, zero-padded to a lane multiple
    x_ref   : (TILE_B, T*C) log-probs, row-major flatten of (T, C) — lane dense
    tgt_ref : (TILE_B, 1)   int32 class targets
    len_ref : (TILE_B, 1)   int32 lengths (-1 marks batch-padding rows)
    out_ref : (1, 8, 128)   f32 packed partials: [0,0,0] = numerator,
                            [0,1,0] = valid-row count
    """
    x = x_ref[...]                      # native dtype: select/reduce stay narrow
    tgt = tgt_ref[...]                  # (TB, 1)
    lng = len_ref[...]                  # (TB, 1)
    tb, tc = x.shape

    valid = lng >= 0                                           # padded rows -> False
    L = jnp.minimum(jnp.maximum(lng, 0), seq_len)              # (TB, 1)
    # torch indexes mask[i, L-1]; L == 0 wraps to the last timestep (t = T-1).
    t_eff = jnp.where(L >= 1, L - 1, seq_len - 1)
    flat_idx = jnp.where(valid, t_eff * num_classes + tgt, -1)  # (TB, 1)

    lane = lax.broadcasted_iota(jnp.int32, (tb, tc), 1)         # (TB, T*C)
    picked = jnp.where(lane == flat_idx, x, jnp.zeros_like(x))  # native dtype
    # At most one nonzero per row -> summing in the native dtype is exact.
    per_row = jnp.sum(picked, axis=1, keepdims=True).astype(jnp.float32)

    # Traced class-weight gather via the same lane-compare (no baked constants).
    cw = w_ref.shape[1]
    cls = lax.broadcasted_iota(jnp.int32, (tb, cw), 1)          # (TB, C_pad)
    w_sel = jnp.sum(jnp.where(cls == tgt, w_ref[...], 0.0),
                    axis=1, keepdims=True)                      # (TB, 1)

    block_num = jnp.sum(-(w_sel * per_row))                     # scalar
    block_den = jnp.sum(valid.astype(jnp.float32))              # scalar

    # Pack both partials into a single (8,128) tile: sublane 0 = num, 1 = den.
    sub = lax.broadcasted_iota(jnp.int32, (8, 128), 0)
    tile = jnp.where(sub == 0, block_num, 0.0)
    tile = jnp.where(sub == 1, block_den, tile)
    out_ref[...] = tile[None, :, :]


def nll_sequence_loss(x, length, target, w=(0.55, 0.45), *, tile_bytes=8 << 20):
    """x: (B, T, C) log-probs (native dtype), length: (B,) int, target: (B,) int."""
    B, T, C = x.shape

    # Free, layout-preserving flatten: last axis becomes T*C (lane dense).
    # NOTE: with the default row-major layout this lowers to a bitcast; if the
    # producer hands over a lane-padded (B,T,C) layout XLA would insert a full
    # HBM relayout copy here — keep the producer row-major / fused.
    x_flat = x.reshape(B, T * C)

    itemsize = jnp.dtype(x.dtype).itemsize
    sublane = {4: 8, 2: 16, 1: 32}.get(itemsize, 8)

    # Batch tile sized to ~tile_bytes of x per block (multiple of sublane).
    row_bytes = T * C * itemsize
    tile_b = max(sublane, (tile_bytes // max(1, row_bytes)) // sublane * sublane)
    b_ceil = pl.cdiv(B, sublane) * sublane
    tile_b = min(tile_b, b_ceil)
    b_pad = pl.cdiv(B, tile_b) * tile_b
    grid = b_pad // tile_b
    # TODO(synk): for very long T (row_bytes in the many-KiB range) switch to a
    # scalar-prefetch / manual-DMA gather fetching only the C-wide slice at
    # t = min(T, len_b) - 1 per row; the streaming path reads ~T x the minimum.

    tgt = target.astype(jnp.int32).reshape(B, 1)
    lng = length.astype(jnp.int32).reshape(B, 1)
    if b_pad != B:
        pad = b_pad - B
        x_flat = jnp.pad(x_flat, ((0, pad), (0, 0)))
        tgt = jnp.pad(tgt, ((0, pad), (0, 0)))
        lng = jnp.pad(lng, ((0, pad), (0, 0)), constant_values=-1)  # sentinel: ignore

    c_pad = pl.cdiv(C, 128) * 128
    w_arr = jnp.zeros((1, c_pad), jnp.float32).at[0, :C].set(
        jnp.asarray(w, dtype=jnp.float32))

    kernel = functools.partial(_nll_seq_loss_kernel, seq_len=T, num_classes=C)

    part = pl.pallas_call(
        kernel,
        out_shape=jax.ShapeDtypeStruct((grid, 8, 128), jnp.float32),
        grid=(grid,),
        in_specs=[
            pl.BlockSpec((1, c_pad), lambda i: (0, 0)),          # weights (traced)
            pl.BlockSpec((tile_b, T * C), lambda i: (i, 0)),     # x (streamed)
            pl.BlockSpec((tile_b, 1), lambda i: (i, 0)),         # target
            pl.BlockSpec((tile_b, 1), lambda i: (i, 0)),         # length
        ],
        out_specs=pl.BlockSpec((1, 8, 128), lambda i: (i, 0, 0)),  # packed partials
        compiler_params=pltpu.CompilerParams(
            # Single batch axis marked parallel: v7x shards blocks across both
            # TensorCores; no-op (but harmless) on single-TC v5e/v6e.
            dimension_semantics=("parallel",),
            vmem_limit_bytes=32 * 1024 * 1024,   # 2 x 8 MiB tiles + outputs << 32 MiB
        ),
        cost_estimate=pl.CostEstimate(
            flops=3 * B * T * C,
            transcendentals=0,
            bytes_accessed=B * T * C * itemsize,
        ),
    )(w_arr, x_flat, tgt, lng)

    num = jnp.sum(part[:, 0, 0])
    den = jnp.sum(part[:, 1, 0])
    return num / den


def _reference(x, length, target, w=(0.55, 0.45)):
    """Pure-JAX reference mirroring the PyTorch forward (incl. length==0 wrap)."""
    B, T, C = x.shape
    w_arr = jnp.asarray(w, dtype=jnp.float32)
    logp = jnp.take_along_axis(
        x.astype(jnp.float32), target[:, None, None].astype(jnp.int32), axis=2
    )[:, :, 0]                                                   # (B, T)
    loss = -w_arr[target][:, None] * logp
    L = jnp.minimum(length, T)
    idx = jnp.where(L >= 1, L - 1, T - 1)   # torch: mask[i, -1] when length == 0
    mask = (jnp.arange(T)[None, :] == idx[:, None]).astype(jnp.float32)
    return jnp.sum(loss * mask) / jnp.sum(mask)


if __name__ == "__main__":
    key = jax.random.PRNGKey(0)
    B, T, C = 4, 8, 2  # batch, sequence length, num classes (len(w) == 2)

    k1, k2, k3 = jax.random.split(key, 3)
    logits = jax.random.normal(k1, (B, T, C), dtype=jnp.float32)
    x = jax.nn.log_softmax(logits, axis=-1)          # log-probs, as NLLLoss expects
    target = jax.random.randint(k2, (B,), 0, C, dtype=jnp.int32)
    length = jax.random.randint(k3, (B,), 1, T + 1, dtype=jnp.int32)
    length = length.at[0].set(0)   # exercise the torch length==0 wrap-to-last path

    out = nll_sequence_loss(x, length, target)
    out = jax.block_until_ready(out)

    ref = _reference(x, length, target)
    assert jnp.allclose(out, ref, rtol=1e-5, atol=1e-6), (out, ref)

    print("KERNEL_OK")
</pallas_src>

<mosaic_0001>
module attributes {stable_mosaic.version = 11 : i64} {
  func.func @_nll_seq_loss_kernel(%arg0: i32, %arg1: memref<1x128xf32, #tpu.memory_space<vmem>>, %arg2: memref<8x16xf32, #tpu.memory_space<vmem>>, %arg3: memref<8x1xi32, #tpu.memory_space<vmem>>, %arg4: memref<8x1xi32, #tpu.memory_space<vmem>>, %arg5: memref<1x8x128xf32, #tpu.memory_space<vmem>>) attributes {dimension_semantics = [#tpu.dimension_semantics<parallel>], iteration_bounds = array<i64: 1>, scalar_prefetch = 0 : i64, scratch_operands = 0 : i64, tpu.core_type = #tpu.core_type<tc>, window_params = [{pipeline_mode = #tpu.pipeline_mode<synchronous>, transform_indices = @transform_0, window_bounds = array<i64: 1, 128>}, {transform_indices = @transform_1, window_bounds = array<i64: 8, 16>}, {transform_indices = @transform_2, window_bounds = array<i64: 8, 1>}, {transform_indices = @transform_3, window_bounds = array<i64: 8, 1>}, {transform_indices = @transform_4, window_bounds = array<i64: 1, 8, 128>}]} {
    %c0 = arith.constant 0 : index
    %c0_0 = arith.constant 0 : index
    %0 = vector.load %arg2[%c0, %c0_0] : memref<8x16xf32, #tpu.memory_space<vmem>>, vector<8x16xf32>
    %c0_1 = arith.constant 0 : index
    %c0_2 = arith.constant 0 : index
    %1 = vector.load %arg3[%c0_1, %c0_2] : memref<8x1xi32, #tpu.memory_space<vmem>>, vector<8x1xi32>
    %c0_3 = arith.constant 0 : index
    %c0_4 = arith.constant 0 : index
    %2 = vector.load %arg4[%c0_3, %c0_4] : memref<8x1xi32, #tpu.memory_space<vmem>>, vector<8x1xi32>
    %c0_i32 = arith.constant 0 : i32
    %3 = vector.broadcast %c0_i32 : i32 to vector<8x1xi32>
    %4 = arith.cmpi sge, %2, %3 : vector<8x1xi32>
    %c0_i32_5 = arith.constant 0 : i32
    %5 = vector.broadcast %c0_i32_5 : i32 to vector<8x1xi32>
    %6 = arith.maxsi %2, %5 : vector<8x1xi32>
    %c8_i32 = arith.constant 8 : i32
    %7 = vector.broadcast %c8_i32 : i32 to vector<8x1xi32>
    %8 = arith.minsi %6, %7 : vector<8x1xi32>
    %c1_i32 = arith.constant 1 : i32
    %9 = vector.broadcast %c1_i32 : i32 to vector<8x1xi32>
    %10 = arith.cmpi sge, %8, %9 : vector<8x1xi32>
    %c1_i32_6 = arith.constant 1 : i32
    %11 = vector.broadcast %c1_i32_6 : i32 to vector<8x1xi32>
    %12 = arith.subi %8, %11 : vector<8x1xi32>
    %c7_i32 = arith.constant 7 : i32
    %13 = vector.broadcast %c7_i32 : i32 to vector<8x1xi32>
    %14 = arith.select %10, %12, %13 : vector<8x1xi1>, vector<8x1xi32>
    %c2_i32 = arith.constant 2 : i32
    %15 = vector.broadcast %c2_i32 : i32 to vector<8x1xi32>
    %16 = arith.muli %14, %15 : vector<8x1xi32>
    %17 = arith.addi %16, %1 : vector<8x1xi32>
    %c-1_i32 = arith.constant -1 : i32
    %18 = vector.broadcast %c-1_i32 : i32 to vector<8x1xi32>
    %19 = arith.select %4, %17, %18 : vector<8x1xi1>, vector<8x1xi32>
    %20 = tpu.iota {dimensions = array<i32: 1>} : vector<8x16xi32>
    %21 = vector.broadcast %19 : vector<8x1xi32> to vector<8x16xi32>
    %22 = arith.cmpi eq, %20, %21 : vector<8x16xi32>
    %cst = arith.constant 0.000000e+00 : f32
    %23 = vector.broadcast %cst : f32 to vector<8x16xf32>
    %24 = arith.select %22, %0, %23 : vector<8x16xi1>, vector<8x16xf32>
    %cst_7 = arith.constant dense<0.000000e+00> : vector<8xf32>
    %25 = vector.multi_reduction <add>, %24, %cst_7 [1] : vector<8x16xf32> to vector<8xf32>
    %26 = vector.shape_cast %25 : vector<8xf32> to vector<8x1xf32>
    %27 = tpu.iota {dimensions = array<i32: 1>} : vector<8x128xi32>
    %28 = vector.broadcast %1 : vector<8x1xi32> to vector<8x128xi32>
    %29 = arith.cmpi eq, %27, %28 : vector<8x128xi32>
    %c0_8 = arith.constant 0 : index
    %c0_9 = arith.constant 0 : index
    %30 = vector.load %arg1[%c0_8, %c0_9] : memref<1x128xf32, #tpu.memory_space<vmem>>, vector<1x128xf32>
    %cst_10 = arith.constant 0.000000e+00 : f32
    %31 = vector.shape_cast %30 : vector<1x128xf32> to vector<1x128xf32>
    %32 = vector.broadcast %31 : vector<1x128xf32> to vector<8x128xf32>
    %33 = vector.broadcast %cst_10 : f32 to vector<8x128xf32>
    %34 = arith.select %29, %32, %33 : vector<8x128xi1>, vector<8x128xf32>
    %cst_11 = arith.constant dense<0.000000e+00> : vector<8xf32>
    %35 = vector.multi_reduction <add>, %34, %cst_11 [1] : vector<8x128xf32> to vector<8xf32>
    %36 = vector.shape_cast %35 : vector<8xf32> to vector<8x1xf32>
    %37 = arith.mulf %36, %26 : vector<8x1xf32>
    %cst_12 = arith.constant 0.000000e+00 : f32
    %38 = vector.broadcast %cst_12 : f32 to vector<8x1xf32>
    %39 = arith.subf %38, %37 : vector<8x1xf32>
    %40 = vector.shape_cast %39 : vector<8x1xf32> to vector<1x8x1xf32>
    %cst_13 = arith.constant dense<0.000000e+00> : vector<1xf32>
    %41 = vector.multi_reduction <add>, %40, %cst_13 [1, 2] : vector<1x8x1xf32> to vector<1xf32>
    %42 = vector.shape_cast %41 : vector<1xf32> to vector<1x1x1xf32>
    %43 = vector.extract %42[0, 0, 0] : f32 from vector<1x1x1xf32>
    %44 = arith.extui %4 : vector<8x1xi1> to vector<8x1xi32>
    %45 = arith.sitofp %44 : vector<8x1xi32> to vector<8x1xf32>
    %46 = vector.shape_cast %45 : vector<8x1xf32> to vector<1x8x1xf32>
    %cst_14 = arith.constant dense<0.000000e+00> : vector<1xf32>
    %47 = vector.multi_reduction <add>, %46, %cst_14 [1, 2] : vector<1x8x1xf32> to vector<1xf32>
    %48 = vector.shape_cast %47 : vector<1xf32> to vector<1x1x1xf32>
    %49 = vector.extract %48[0, 0, 0] : f32 from vector<1x1x1xf32>
    %50 = tpu.iota {dimensions = array<i32: 0>} : vector<8x128xi32>
    %c0_i32_15 = arith.constant 0 : i32
    %51 = vector.broadcast %c0_i32_15 : i32 to vector<8x128xi32>
    %52 = arith.cmpi eq, %50, %51 : vector<8x128xi32>
    %cst_16 = arith.constant 0.000000e+00 : f32
    %53 = vector.broadcast %43 : f32 to vector<8x128xf32>
    %54 = vector.broadcast %cst_16 : f32 to vector<8x128xf32>
    %55 = arith.select %52, %53, %54 : vector<8x128xi1>, vector<8x128xf32>
    %c1_i32_17 = arith.constant 1 : i32
    %56 = vector.broadcast %c1_i32_17 : i32 to vector<8x128xi32>
    %57 = arith.cmpi eq, %50, %56 : vector<8x128xi32>
    %58 = vector.broadcast %49 : f32 to vector<8x128xf32>
    %59 = arith.select %57, %58, %55 : vector<8x128xi1>, vector<8x128xf32>
    %60 = vector.shape_cast %59 : vector<8x128xf32> to vector<1x8x128xf32>
    %c0_18 = arith.constant 0 : index
    %c0_19 = arith.constant 0 : index
    %c0_20 = arith.constant 0 : index
    %61 = vector.load %arg5[%c0_18, %c0_19, %c0_20] : memref<1x8x128xf32, #tpu.memory_space<vmem>>, vector<1x8x128xf32>
    tpu.vector_store %arg5[%c0_18, %c0_19, %c0_20], %60 {strides = array<i32>} : memref<1x8x128xf32, #tpu.memory_space<vmem>>, vector<1x8x128xf32>,
    return
  }
  func.func @transform_0(%arg0: i32) -> (i32, i32) {
    %c0_i32 = arith.constant 0 : i32
    %c0_i32_0 = arith.constant 0 : i32
    %c0_i32_1 = arith.constant 0 : i32
    return %c0_i32, %c0_i32_0 : i32, i32
  }
  func.func @transform_1(%arg0: i32) -> (i32, i32) {
    %c0_i32 = arith.constant 0 : i32
    %c0_i32_0 = arith.constant 0 : i32
    return %arg0, %c0_i32 : i32, i32
  }
  func.func @transform_2(%arg0: i32) -> (i32, i32) {
    %c0_i32 = arith.constant 0 : i32
    %c0_i32_0 = arith.constant 0 : i32
    return %arg0, %c0_i32 : i32, i32
  }
  func.func @transform_3(%arg0: i32) -> (i32, i32) {
    %c0_i32 = arith.constant 0 : i32
    %c0_i32_0 = arith.constant 0 : i32
    return %arg0, %c0_i32 : i32, i32
  }
  func.func @transform_4(%arg0: i32) -> (i32, i32, i32) {
    %c0_i32 = arith.constant 0 : i32
    %c0_i32_0 = arith.constant 0 : i32
    %c0_i32_1 = arith.constant 0 : i32
    return %arg0, %c0_i32, %c0_i32_0 : i32, i32, i32
  }
}

</mosaic_0001>

<bundles_post_ra>
// kernel: tpu_custom_call.1
= control target key start
LH: loop header
LB: loop body
LE: loop exit
PB: predicated region body
PF: predicated region fallthrough
CT: control target
= control target key end

     0   :  { %s183_s0 = inlined_call_operand.vmem [shape: f32[1,128], index: 0, kind: input, shape index: {}]   ;;  %s184_s1 = inlined_call_operand.vmem [shape: f32[8,16], index: 1, kind: input, shape index: {}]   ;;  %s185_s2 = inlined_call_operand.vmem [shape: s32[8,1], index: 2, kind: input, shape index: {}]   ;;  %s186_s3 = inlined_call_operand.vmem [shape: s32[8,1], index: 3, kind: input, shape index: {}]   ;;  %s187_s4 = inlined_call_operand.hbm [shape: f32[1,8,128], index: 4, kind: output, shape index: {}]  }
   0x1   :  { %v20_v0 = vld [vmem:[%s186_s3] sm:$0xff] }
   0x2   :  { %9 = vsyncpa [#allocation3], 0  ;;  %v138_v1 = vmov 0   ;;  %vm22_vm0 = vcmp.gt.s32.totalorder %v20_v0, 0  ;;  %v19_v5 = vld [vmem:[%s185_s2] sm:$0xff]  ;;  %vm21_vm3 = vcmp.ge.s32.totalorder %v20_v0, 0  ;;  %v32_v10 = vlaneseq }
   0x3   :  { %115 = vset.pattern.permute.xlu0 %v138_v1  ;;  %v23_v2 = vsel %vm22_vm0, %v20_v0, 0  ;;  %v18_v12 = vld [vmem:[%s184_s1] sm:$0xff]  ;;  %vm39_vm4 = vcmask 130048   ;;  %vm59_vm7 = vcmask 7168   ;;  %v139_v19 = vmov 0.0  }
   0x4   :  { %vm24_vm1 = vcmp.lt.s32.totalorder %v23_v2, 8  ;;  %v33_v11 = vand.u32 127, %v32_v10  ;;  %v106_v16 = vld [vmem:[%s183_s0] ss:$0 sm:$0xff]  ;;  %v107_v20 = vsel %vm21_vm3, 1.0, %v139_v19  ;;  %v83_v41 = vshrl.u32 %v32_v10, 7 }
   0x5   :  { %v25_v3 = vsel %vm24_vm1, %v23_v2, 8  ;;  %v72_v21 = vsel %vm59_vm7, %v107_v20, 0.0  ;;  %s140_s0 = smov [#allocation2]  }
   0x6   :  { %vm26_vm2 = vcmp.ge.s32.totalorder %v25_v3, 1  ;;  %v105_v4 = vadd.s32 4294967295, %v25_v3  ;;  %vm84_vm8 = vcmp.eq.s32.totalorder %v83_v41, 0  ;;  %s97_s1 = sshll.u32 %s140_s0, 4  ;;  %vm87_vm9 = vcmp.eq.s32.totalorder %v83_v41, 1  ;;  %s98_s1 = int_to_ptr.vmem [resolvable:$true] %s97_s1 }
   0x7   :  { %s116_s23 = scalar_lea.vmem %s98_s1, 128  ;;  %p121_p1 = scmp.lt.s32.totalorder %s98_s1, %s98_s1 }
   0x8   :  { %v28_v6 = vsel %vm26_vm2, %v105_v4, 7  ;;  %p117_p0 = scmp.ne.s32.totalorder %s98_s1, %s116_s23  ;;  %p122_p2 = scmp.lt.s32.totalorder %s116_s23, %s116_s23 }
   0x9   :  { %v29_v7 = vmul.u32 2, %v28_v6 }
   0xa   :  { %p123_p3 = por %p122_p2, %p121_p1 }
   0xb   :  { %v30_v8 = vadd.s32 %v29_v7, %v19_v5 }
   0xc   :  { %p124_p4 = pnand %p123_p3, %p117_p0 }
   0xd   :  { %v31_v9 = vsel %vm21_vm3, %v30_v8, 4294967295 }
   0xe   :  { %35 = vperm.xlu0 %115, %v31_v9  }
  0x12   :  { %44 = vperm.xlu0 %115, %v19_v5  }
  0x89   :  { %v36_v13 = vpop.permute.xlu0 %35 }
  0x8a   :  { %vm37_vm5 = vcmp.eq.s32.totalorder %v33_v11, %v36_v13 }
  0x8b   :  { %v38_v14 = vsel %vm37_vm5, %v18_v12, 0.0 }
  0x8c   :  { %v40_v15 = vsel %vm39_vm4, %v38_v14, 0.0 }
  0x8d   :  { %v45_v17 = vpop.permute.xlu0 %44  ;;  %41 = vadd.xlane.f32.xlu1 %v40_v15 }
  0x8e   :  { %vm46_vm6 = vcmp.eq.s32.totalorder %v33_v11, %v45_v17 }
  0x8f   :  { %v54_v18 = vsel %vm46_vm6, %v106_v16, 0.0 }
  0x91   :  { %55 = vadd.xlane.f32.xlu1 %v54_v18 }
  0x95   :  { %73 = vadd.xlane.f32.xlu1 %v72_v21 }
 0x116   :  { %v42_v22 = vpop.xlane.xlu1 %41 }
 0x11a   :  { %v56_v23 = vpop.xlane.xlu1 %55 }
 0x11b   :  { %v57_v24 = vmul.f32 %v56_v23, %v42_v22 }
 0x11d   :  { %v58_v25 = vsub.f32 0.0, %v57_v24 }
 0x11e   :  { %v74_v27 = vpop.xlane.xlu1 %73 }
 0x11f   :  { %v60_v26 = vsel %vm59_vm7, %v58_v25, 0.0  ;;  %v75_v28 = vrot.slane %v74_v27, 4 }
 0x120   :  { %61 = vadd.xlane.f32.xlu0 %v60_v26 }
 0x121   :  { %v76_v29 = vadd.f32 %v75_v28, %v74_v27 }
 0x123   :  { %v77_v30 = vrot.slane %v76_v29, 2 }
 0x125   :  { %v78_v34 = vadd.f32 %v77_v30, %v76_v29 }
 0x127   :  { %v79_v37 = vrot.slane %v78_v34, 1 }
 0x129   :  { %v80_v40 = vadd.f32 %v79_v37, %v78_v34 }
 0x1a9   :  { %v62_v31 = vpop.xlane.xlu0 %61 }
 0x1aa   :  { %v63_v32 = vrot.slane %v62_v31, 4 }
 0x1ac   :  { %v64_v33 = vadd.f32 %v63_v32, %v62_v31 }
 0x1ae   :  { %v65_v35 = vrot.slane %v64_v33, 2 }
 0x1b0   :  { %v66_v36 = vadd.f32 %v65_v35, %v64_v33 }
 0x1b2   :  { %v67_v38 = vrot.slane %v66_v36, 1 }
 0x1b4   :  { %v68_v39 = vadd.f32 %v67_v38, %v66_v36 }
 0x1b6   :  { %108 = vpush %v68_v39 }
 0x1b7   :  { %110 = vpush %v80_v40 }
 0x1e7   :  { %s109_s21 = spop %108 }
 0x1e8   :  { %v85_v42 = vstv %s109_s21  ;;  %s111_s22 = spop %110 }
 0x1e9   :  { %v86_v43 = vsel %vm84_vm8, %v85_v42, 0.0  ;;  %v88_v44 = vstv %s111_s22 }
 0x1ea   :  { %v89_v45 = vsel %vm87_vm9, %v88_v44, %v86_v43 }
 0x1eb   :  { %90 = vst [vmem:[#allocation2] sm:$0xff] %v89_v45 }
 0x1ec   :  { %127 = shalt.err (!%p124_p4)
}
 0x1ed   :  { %100 = dma.vmem_to_hbm [thread:$0]  %s98_s1, 128, %s187_s4, [#allocation3]  }
 0x1ee   :  { %136 = dma.done.wait [#allocation3], 128  }
 0x1ef   :  { %137 = vsyncadd [#allocation3], 4294967168 }
 0x1f0   :  { %104 = vsyncpa [#allocation3], 1 }

</bundles_post_ra>
